<compile_context>
chip_gen: v7x
topology: tpu7x:2x2x1
jax: 0.10.0
libtpu: 0.0.40
codegen_flags: <defaults>
</compile_context>

<pallas_src>
import functools
import math

import jax
import jax.numpy as jnp
from jax.experimental import pallas as pl
from jax.experimental.pallas import tpu as pltpu


# ----------------------------------------------------------------------------
# Kernel-side math
# ----------------------------------------------------------------------------
def _focal_loss_block(logits, code_f32, gamma, alpha):
    """Elementwise focal loss for one lane-dense tile (runs inside kernel).

    logits:   (tile_rows, FC) any float dtype
    code_f32: (tile_rows, FC) float32 in {0., 1., 2.}
    """
    x = logits.astype(jnp.float32)
    # Stable log-sigmoid terms (one shared exp + one shared log1p):
    #   log_p   = log(sigmoid(x))     = min(x, 0)  - log1p(exp(-|x|))
    #   log_1mp = log(1 - sigmoid(x)) = min(-x, 0) - log1p(exp(-|x|))
    soft = jnp.log1p(jnp.exp(-jnp.abs(x)))
    log_p = jnp.minimum(x, 0.0) - soft
    log_1mp = jnp.minimum(-x, 0.0) - soft

    if float(gamma) == 2.0:
        one_mp = jnp.exp(log_1mp)           # (1 - p), always finite in (0, 1]
        p = 1.0 - one_mp
        pow_1mp = one_mp * one_mp           # (1 - p)^2   (VPU)
        pow_p = p * p                       # p^2         (VPU)
    else:
        pow_1mp = jnp.exp(gamma * log_1mp)  # (1 - p)^gamma
        pow_p = jnp.exp(gamma * log_p)      # p^gamma

    is_pos = code_f32 == 1.0
    is_neg = code_f32 == 2.0
    # weight: alpha for positives, (1 - alpha) for valid negatives, 0 ignored.
    weight = jnp.where(is_pos, jnp.float32(alpha),
                       jnp.where(is_neg, jnp.float32(1.0 - alpha),
                                 jnp.float32(0.0)))
    # term: (1-p)^g * log(p) for positives, p^g * log(1-p) otherwise.
    term = jnp.where(is_pos, pow_1mp * log_p, pow_p * log_1mp)
    return -(weight * term)


def _focal_none_kernel(logits_ref, code_ref, out_ref, *, gamma, alpha):
    loss = _focal_loss_block(logits_ref[...],
                             code_ref[...].astype(jnp.float32), gamma, alpha)
    out_ref[...] = loss.astype(out_ref.dtype)


def _focal_partial_sum_kernel(logits_ref, code_ref, out_ref, *, gamma, alpha):
    loss = _focal_loss_block(logits_ref[...],
                             code_ref[...].astype(jnp.float32), gamma, alpha)
    tr, fc = loss.shape
    # Reduce only the major (vreg-tile) axis: pure VPU adds on a
    # layout-preserving reshape.  The final cross-lane/sublane reduce happens
    # once, outside the kernel, on a tiny (num_blocks, 8, fc) array.
    out_ref[0] = jnp.sum(loss.reshape(tr // 8, 8, fc), axis=0)


# ----------------------------------------------------------------------------
# Wrapper
# ----------------------------------------------------------------------------
def _fold_params(n, c):
    """Fold factor F so F*C is a multiple of 128, plus tile/pad sizes."""
    f = 128 // math.gcd(c, 128)
    fc = f * c
    r = -(-n // f)                               # folded rows needed
    target_elems = 512 * 1024                    # ~2 MiB f32 per logits block
    tr = max(32, (max(1, target_elems // fc) // 32) * 32)
    r_ceil = ((max(r, 1) + 31) // 32) * 32       # 32 keeps bf16/int8 packing legal
    tile_rows = min(tr, r_ceil)                  # multiple of 32
    r_pad = ((max(r, 1) + tile_rows - 1) // tile_rows) * tile_rows
    return f, fc, tile_rows, r_pad


def sigmoid_focal_loss(logits, targets, gamma, alpha, reduction="none"):
    """Pallas-backed sigmoid focal loss.

    logits:  [N, C] float (f32 or bf16)
    targets: [N]    int   (1-indexed class; 0 = background; <0 = ignore)
    """
    if reduction not in ("none", "sum", "mean"):
        raise ValueError(f"unknown reduction: {reduction}")

    n, c = logits.shape
    f, fc, tile_rows, r_pad = _fold_params(n, c)
    n_pad = r_pad * f
    num_blocks = r_pad // tile_rows

    # Pad anchors; padded rows get target -1 (ignored -> exactly zero loss).
    logits_p = jnp.pad(logits, ((0, n_pad - n), (0, 0)))
    targets_p = jnp.pad(targets.astype(jnp.int32), (0, n_pad - n),
                        constant_values=-1)

    # 1-byte per-element code: 1 = positive, 2 = valid negative, 0 = ignore.
    class_range = jnp.arange(1, c + 1, dtype=jnp.int32)[None, :]
    t2d = targets_p[:, None]
    code = jnp.where(t2d == class_range, jnp.int8(1),
                     jnp.where(t2d >= 0, jnp.int8(2), jnp.int8(0)))

    logits_fold = logits_p.reshape(r_pad, fc)      # free reshape (contiguous)
    code_fold = code.reshape(r_pad, fc)

    total_elems = r_pad * fc
    n_trans = 3 if float(gamma) == 2.0 else 4
    in_bytes = total_elems * (logits.dtype.itemsize + 1)

    in_specs = [pl.BlockSpec((tile_rows, fc), lambda i: (i, 0)),
                pl.BlockSpec((tile_rows, fc), lambda i: (i, 0))]

    if reduction == "none":
        out = pl.pallas_call(
            functools.partial(_focal_none_kernel, gamma=float(gamma),
                              alpha=float(alpha)),
            out_shape=jax.ShapeDtypeStruct((r_pad, fc), logits.dtype),
            grid=(num_blocks,),
            in_specs=in_specs,
            out_specs=pl.BlockSpec((tile_rows, fc), lambda i: (i, 0)),
            compiler_params=pltpu.CompilerParams(
                dimension_semantics=("parallel",)),
            cost_estimate=pl.CostEstimate(
                flops=16 * total_elems,
                transcendentals=n_trans * total_elems,
                bytes_accessed=in_bytes + total_elems * logits.dtype.itemsize),
        )(logits_fold, code_fold)
        return out.reshape(n_pad, c)[:n]

    partials = pl.pallas_call(
        functools.partial(_focal_partial_sum_kernel, gamma=float(gamma),
                          alpha=float(alpha)),
        out_shape=jax.ShapeDtypeStruct((num_blocks, 8, fc), jnp.float32),
        grid=(num_blocks,),
        in_specs=in_specs,
        out_specs=pl.BlockSpec((1, 8, fc), lambda i: (i, 0, 0)),
        compiler_params=pltpu.CompilerParams(
            dimension_semantics=("parallel",)),
        cost_estimate=pl.CostEstimate(
            flops=17 * total_elems,
            transcendentals=n_trans * total_elems,
            bytes_accessed=in_bytes + num_blocks * 8 * fc * 4),
    )(logits_fold, code_fold)

    total = jnp.sum(partials)          # tiny cross-block epilogue reduction
    if reduction == "mean":
        total = total / jnp.float32(n * c)
    return total.astype(logits.dtype)


class SigmoidFocalLoss:
    """JAX mirror of the PyTorch SigmoidFocalLoss module."""

    def __init__(self, alpha: float, gamma: float, reduction: str):
        self.alpha = alpha
        self.gamma = gamma
        self.reduction = reduction

    def __call__(self, logits, targets):
        return sigmoid_focal_loss(logits, targets, self.gamma, self.alpha,
                                  reduction=self.reduction)

    def __repr__(self):
        return f"{self.__class__.__name__}(alpha={self.alpha}, gamma={self.gamma})"


# ----------------------------------------------------------------------------
# Pure-JAX reference (same formulation as the maskrcnn-benchmark CUDA op)
# ----------------------------------------------------------------------------
def _reference(logits, targets, gamma, alpha, reduction):
    n, c = logits.shape
    class_range = jnp.arange(1, c + 1, dtype=jnp.int32)[None, :]
    t = targets.astype(jnp.int32)[:, None]
    p = jax.nn.sigmoid(logits.astype(jnp.float32))
    term1 = (1.0 - p) ** gamma * jnp.log(p)
    term2 = p ** gamma * jnp.log(1.0 - p)
    loss = (-(t == class_range).astype(jnp.float32) * term1 * alpha
            - ((t != class_range) & (t >= 0)).astype(jnp.float32)
            * term2 * (1.0 - alpha))
    if reduction == "sum":
        return jnp.sum(loss)
    if reduction == "mean":
        return jnp.mean(loss)
    return loss


if __name__ == "__main__":
    key = jax.random.PRNGKey(0)
    k_logits, k_targets = jax.random.split(key)

    N, C = 64, 8  # 64 anchors, 8 foreground classes
    logits = jax.random.normal(k_logits, (N, C), dtype=jnp.float32) * 2.0
    # targets in [-1, C]: -1 = ignore, 0 = background, 1..C = class index
    targets = jax.random.randint(k_targets, (N,), -1, C + 1, dtype=jnp.int32)

    ok = True
    for reduction in ("none", "sum", "mean"):
        module = SigmoidFocalLoss(alpha=0.25, gamma=2.0, reduction=reduction)
        out = jax.block_until_ready(module(logits, targets))
        ref = jax.block_until_ready(
            _reference(logits, targets, 2.0, 0.25, reduction))
        if out.shape != ref.shape or not jnp.allclose(out, ref,
                                                      rtol=1e-4, atol=1e-5):
            ok = False

    if ok:
        print("KERNEL_OK")
</pallas_src>

<mosaic_0001>
module attributes {stable_mosaic.version = 11 : i64} {
  func.func @_focal_none_kernel(%arg0: i32, %arg1: memref<32x128xf32, #tpu.memory_space<vmem>>, %arg2: memref<32x128xi8, #tpu.memory_space<vmem>>, %arg3: memref<32x128xf32, #tpu.memory_space<vmem>>) attributes {dimension_semantics = [#tpu.dimension_semantics<parallel>], iteration_bounds = array<i64: 1>, scalar_prefetch = 0 : i64, scratch_operands = 0 : i64, tpu.core_type = #tpu.core_type<tc>, window_params = [{transform_indices = @transform_0, window_bounds = array<i64: 32, 128>}, {transform_indices = @transform_1, window_bounds = array<i64: 32, 128>}, {transform_indices = @transform_2, window_bounds = array<i64: 32, 128>}]} {
    %c0 = arith.constant 0 : index
    %c0_0 = arith.constant 0 : index
    %0 = vector.load %arg1[%c0, %c0_0] : memref<32x128xf32, #tpu.memory_space<vmem>>, vector<32x128xf32>
    %c0_1 = arith.constant 0 : index
    %c0_2 = arith.constant 0 : index
    %1 = vector.load %arg2[%c0_1, %c0_2] : memref<32x128xi8, #tpu.memory_space<vmem>>, vector<32x128xi8>
    %2 = arith.sitofp %1 : vector<32x128xi8> to vector<32x128xf32>
    %3 = math.absf %0 : vector<32x128xf32>
    %cst = arith.constant 0.000000e+00 : f32
    %4 = vector.broadcast %cst : f32 to vector<32x128xf32>
    %5 = arith.subf %4, %3 : vector<32x128xf32>
    %6 = math.exp %5 : vector<32x128xf32>
    %7 = math.log1p %6 : vector<32x128xf32>
    %cst_3 = arith.constant 0.000000e+00 : f32
    %8 = vector.broadcast %cst_3 : f32 to vector<32x128xf32>
    %9 = arith.minimumf %0, %8 : vector<32x128xf32>
    %10 = arith.subf %9, %7 : vector<32x128xf32>
    %cst_4 = arith.constant 0.000000e+00 : f32
    %11 = vector.broadcast %cst_4 : f32 to vector<32x128xf32>
    %12 = arith.subf %11, %0 : vector<32x128xf32>
    %cst_5 = arith.constant 0.000000e+00 : f32
    %13 = vector.broadcast %cst_5 : f32 to vector<32x128xf32>
    %14 = arith.minimumf %12, %13 : vector<32x128xf32>
    %15 = arith.subf %14, %7 : vector<32x128xf32>
    %16 = math.exp %15 : vector<32x128xf32>
    %cst_6 = arith.constant 1.000000e+00 : f32
    %17 = vector.broadcast %cst_6 : f32 to vector<32x128xf32>
    %18 = arith.subf %17, %16 : vector<32x128xf32>
    %19 = arith.mulf %16, %16 : vector<32x128xf32>
    %20 = arith.mulf %18, %18 : vector<32x128xf32>
    %cst_7 = arith.constant 1.000000e+00 : f32
    %21 = vector.broadcast %cst_7 : f32 to vector<32x128xf32>
    %22 = arith.cmpf oeq, %2, %21 : vector<32x128xf32>
    %cst_8 = arith.constant 2.000000e+00 : f32
    %23 = vector.broadcast %cst_8 : f32 to vector<32x128xf32>
    %24 = arith.cmpf oeq, %2, %23 : vector<32x128xf32>
    %cst_9 = arith.constant 7.500000e-01 : f32
    %cst_10 = arith.constant 0.000000e+00 : f32
    %25 = vector.broadcast %cst_9 : f32 to vector<32x128xf32>
    %26 = vector.broadcast %cst_10 : f32 to vector<32x128xf32>
    %27 = arith.select %24, %25, %26 : vector<32x128xi1>, vector<32x128xf32>
    %cst_11 = arith.constant 2.500000e-01 : f32
    %28 = vector.broadcast %cst_11 : f32 to vector<32x128xf32>
    %29 = arith.select %22, %28, %27 : vector<32x128xi1>, vector<32x128xf32>
    %30 = arith.mulf %19, %10 : vector<32x128xf32>
    %31 = arith.mulf %20, %15 : vector<32x128xf32>
    %32 = arith.select %22, %30, %31 : vector<32x128xi1>, vector<32x128xf32>
    %33 = arith.mulf %29, %32 : vector<32x128xf32>
    %cst_12 = arith.constant 0.000000e+00 : f32
    %34 = vector.broadcast %cst_12 : f32 to vector<32x128xf32>
    %35 = arith.subf %34, %33 : vector<32x128xf32>
    %c0_13 = arith.constant 0 : index
    %c0_14 = arith.constant 0 : index
    %36 = vector.load %arg3[%c0_13, %c0_14] : memref<32x128xf32, #tpu.memory_space<vmem>>, vector<32x128xf32>
    tpu.vector_store %arg3[%c0_13, %c0_14], %35 {strides = array<i32>} : memref<32x128xf32, #tpu.memory_space<vmem>>, vector<32x128xf32>,
    return
  }
  func.func @transform_0(%arg0: i32) -> (i32, i32) {
    %c0_i32 = arith.constant 0 : i32
    %c0_i32_0 = arith.constant 0 : i32
    return %arg0, %c0_i32 : i32, i32
  }
  func.func @transform_1(%arg0: i32) -> (i32, i32) {
    %c0_i32 = arith.constant 0 : i32
    %c0_i32_0 = arith.constant 0 : i32
    return %arg0, %c0_i32 : i32, i32
  }
  func.func @transform_2(%arg0: i32) -> (i32, i32) {
    %c0_i32 = arith.constant 0 : i32
    %c0_i32_0 = arith.constant 0 : i32
    return %arg0, %c0_i32 : i32, i32
  }
}

</mosaic_0001>

<bundles_post_ra>
// kernel: tpu_custom_call.1
= control target key start
LH: loop header
LB: loop body
LE: loop exit
PB: predicated region body
PF: predicated region fallthrough
CT: control target
= control target key end

     0   :  { %7 = vsyncpa [#allocation3], 0  ;;  %s400_s0 = inlined_call_operand.hbm [shape: f32[32,128], index: 0, kind: input, shape index: {}]   ;;  %s401_s1 = inlined_call_operand.hbm [shape: s8[32,128], index: 1, kind: input, shape index: {}]   ;;  %s402_s2 = inlined_call_operand.hbm [shape: f32[32,128], index: 2, kind: output, shape index: {}]  }
   0x1   :  { %8 = vsyncpa [#allocation6], 0 }
   0x2   :  { %9 = vsyncpa [#allocation4], 0  ;;  %s303_s9 = smov [#allocation2]   ;;  %s231_s13 = scalar_lea.hbm %s400_s0, 512 }
   0x3   :  { %s15_s10 = sshll.u32 %s303_s9, 4  ;;  %p232_p0 = scmp.ne.s32.totalorder %s400_s0, %s231_s13  ;;  %s16_s10 = int_to_ptr.vmem [resolvable:$true] %s15_s10 }
   0x4   :  { %p235_p1 = scmp.lt.u32.totalorder %s231_s13, %s400_s0 }
   0x6   :  { %p237_p2 = pnand %p235_p1, %p232_p0 }
   0x8   :  { %240 = shalt.err (!%p237_p2)
}
   0x9   :  { %s241_s18 = scalar_lea.vmem %s16_s10, 512  ;;  %p246_p4 = scmp.lt.s32.totalorder %s16_s10, %s16_s10 }
   0xa   :  { %p242_p3 = scmp.ne.s32.totalorder %s16_s10, %s241_s18  ;;  %p247_p5 = scmp.lt.s32.totalorder %s241_s18, %s241_s18 }
   0xc   :  { %p248_p6 = por %p247_p5, %p246_p4 }
   0xe   :  { %p249_p7 = pnand %p248_p6, %p242_p3 }
  0x10   :  { %252 = shalt.err (!%p249_p7)
}
  0x11   :  { %s304_s19 = smov 128   ;;  %s305_s20 = smov 8  }
  0x12   :  { %21 = dma.hbm_to_vmem [thread:$0]  %s400_s0, 512, %s16_s10, [#allocation3], %s304_s19, %s304_s19, %s305_s20  }
  0x13   :  { %s306_s23 = smov [#allocation5]   ;;  %s253_s27 = scalar_lea.hbm %s401_s1, 128 }
  0x14   :  { %s28_s24 = sshll.u32 %s306_s23, 4  ;;  %p254_p8 = scmp.ne.s32.totalorder %s401_s1, %s253_s27  ;;  %s29_s24 = int_to_ptr.vmem [resolvable:$true] %s28_s24 }
  0x15   :  { %p257_p9 = scmp.lt.u32.totalorder %s253_s27, %s401_s1 }
  0x17   :  { %p259_p10 = pnand %p257_p9, %p254_p8 }
  0x19   :  { %262 = shalt.err (!%p259_p10)
}
  0x1a   :  { %s263_s4 = scalar_lea.vmem %s29_s24, 128  ;;  %p268_p12 = scmp.lt.s32.totalorder %s29_s24, %s29_s24 }
  0x1b   :  { %p264_p11 = scmp.ne.s32.totalorder %s29_s24, %s263_s4  ;;  %p269_p13 = scmp.lt.s32.totalorder %s263_s4, %s263_s4 }
  0x1d   :  { %p270_p0 = por %p269_p13, %p268_p12 }
  0x1f   :  { %p271_p1 = pnand %p270_p0, %p264_p11 }
  0x21   :  { %274 = shalt.err (!%p271_p1)
}
  0x22   :  { %31 = dma.hbm_to_vmem [thread:$0]  %s401_s1, 128, %s29_s24, [#allocation6]  }
  0x23   :  { %297 = dma.done.wait [#allocation3], 512  }
  0x24   :  { %298 = vsyncadd [#allocation3], 4294966784 }
  0x25   :  { %299 = dma.done.wait [#allocation6], 128  }
  0x26   :  { %300 = vsyncadd [#allocation6], 4294967168  ;;  %v351_v0 = vld [vmem:[#allocation2] sm:$0xff]  ;;  %v353_v1 = vld [vmem:[#allocation2 + $0x8] sm:$0xff]  ;;  %s308_s1 = smov [#allocation7]  }
  0x27   :  { %v51_v2 = vand.u32 2147483647, %v351_v0  ;;  %v356_v3 = vld [vmem:[#allocation2 + $0x10] sm:$0xff]  ;;  %v52_v4 = vand.u32 2147483647, %v353_v1  ;;  %v360_v11 = vld [vmem:[#allocation2 + $0x18] sm:$0xff] }
  0x28   :  { %v53_v7 = vand.u32 2147483647, %v356_v3  ;;  %v54_v13 = vand.u32 2147483647, %v360_v11  ;;  %v111_v24 = vsub.f32 0.0, %v351_v0  ;;  %v112_v31 = vsub.f32 0.0, %v353_v1 }
  0x29   :  { %v55_v5 = vsub.f32 0.0, %v51_v2  ;;  %v56_v6 = vsub.f32 0.0, %v52_v4  ;;  %v113_v36 = vsub.f32 0.0, %v356_v3  ;;  %v42_v52 = vld [vmem:[#allocation5] sm:$0xff]  ;;  %v114_v56 = vsub.f32 0.0, %v360_v11  ;;  %s188_s6 = sshll.u32 %s308_s1, 4  ;;  %s189_s6 = int_to_ptr.vmem [resolvable:$true] %s188_s6 }
  0x2a   :  { %v57_v10 = vsub.f32 0.0, %v53_v7  ;;  %v58_v14 = vsub.f32 0.0, %v54_v13  ;;  %v115_v33 = vmin.f32 %v111_v24, 0.0  ;;  %v116_v43 = vmin.f32 %v112_v31, 0.0  ;;  %s275_s7 = scalar_lea.vmem %s189_s6, 512  ;;  %p280_p3 = scmp.lt.s32.totalorder %s189_s6, %s189_s6 }
  0x2b   :  { %v59_v8 = vmul.f32 1.442695, %v55_v5  ;;  %v61_v9 = vmul.f32 1.442695, %v56_v6  ;;  %v117_v47 = vmin.f32 %v113_v36, 0.0  ;;  %v43_v60 = vunpack.c.0.s8 %v42_v52  ;;  %p276_p2 = scmp.ne.s32.totalorder %s189_s6, %s275_s7  ;;  %p281_p4 = scmp.lt.s32.totalorder %s275_s7, %s275_s7 }
  0x2c   :  { %v63_v12 = vmul.f32 1.442695, %v57_v10  ;;  %v65_v15 = vmul.f32 1.442695, %v58_v14  ;;  %v44_v2 = vunpack.c.1.s8 %v42_v52  ;;  %v118_v4 = vmin.f32 %v114_v56, 0.0 }
  0x2d   :  { %207 = vpow2.f32 %v59_v8  ;;  %v47_v7 = vcvt.s32.f32 %v43_v60  ;;  %v45_v8 = vunpack.c.2.s8 %v42_v52  ;;  %v103_v10 = vmin.f32 %v351_v0, 0.0  ;;  %p282_p5 = por %p281_p4, %p280_p3 }
  0x2e   :  { %209 = vpow2.f32 %v61_v9  ;;  %v104_v14 = vmin.f32 %v353_v1, 0.0  ;;  %v307_v24 = vmov 0.0  }
  0x2f   :  { %211 = vpow2.f32 %v63_v12  ;;  %v48_v12 = vcvt.s32.f32 %v44_v2  ;;  %vm147_vm4 = vcmp.eq.f32.partialorder %v47_v7, 2.0  ;;  %vm143_vm6 = vcmp.eq.f32.partialorder %v47_v7, 1.0  ;;  %p283_p6 = pnand %p282_p5, %p276_p2 }
  0x30   :  { %213 = vpow2.f32 %v65_v15 }
  0x31   :  { %vm148_vm5 = vcmp.eq.f32.partialorder %v48_v12, 2.0  ;;  %vm144_vm7 = vcmp.eq.f32.partialorder %v48_v12, 1.0 }
  0x37   :  { %v208_v16 = vpop.eup %207 }
  0x38   :  { %v210_v17 = vpop.eup %209  ;;  %v67_v18 = vadd.f32 1.0, %v208_v16  ;;  %v70_v21 = vmul.f32 -0.5, %v208_v16  ;;  %v73_v28 = vand.u32 2147483647, %v208_v16 }
  0x39   :  { %v76_v19 = vadd.f32 1.0, %v210_v17  ;;  %v212_v20 = vpop.eup %211  ;;  %v79_v22 = vmul.f32 -0.5, %v210_v17  ;;  %v82_v30 = vand.u32 2147483647, %v210_v17 }
  0x3a   :  { %215 = vlog2.f32 %v67_v18  ;;  %v85_v23 = vadd.f32 1.0, %v212_v20  ;;  %v71_v25 = vadd.f32 1.0, %v70_v21  ;;  %v88_v26 = vmul.f32 -0.5, %v212_v20  ;;  %v214_v27 = vpop.eup %213 }
  0x3b   :  { %217 = vlog2.f32 %v76_v19  ;;  %v80_v29 = vadd.f32 1.0, %v79_v22  ;;  %v94_v32 = vadd.f32 1.0, %v214_v27  ;;  %vm74_vm0 = vcmp.lt.f32.partialorder %v73_v28, 0.0004427343 }
  0x3c   :  { %219 = vlog2.f32 %v85_v23  ;;  %v72_v34 = vmul.f32 %v208_v16, %v71_v25  ;;  %v89_v35 = vadd.f32 1.0, %v88_v26  ;;  %v91_v39 = vand.u32 2147483647, %v212_v20 }
  0x3d   :  { %221 = vlog2.f32 %v94_v32  ;;  %v81_v38 = vmul.f32 %v210_v17, %v80_v29  ;;  %v97_v40 = vmul.f32 -0.5, %v214_v27  ;;  %vm83_vm1 = vcmp.lt.f32.partialorder %v82_v30, 0.0004427343 }
  0x3e   :  { %v90_v46 = vmul.f32 %v212_v20, %v89_v35  ;;  %vm92_vm2 = vcmp.lt.f32.partialorder %v91_v39, 0.0004427343  ;;  %v100_v55 = vand.u32 2147483647, %v214_v27  ;;  %v49_v16 = vcvt.s32.f32 %v45_v8 }
  0x3f   :  { %v98_v51 = vadd.f32 1.0, %v97_v40  ;;  %v105_v18 = vmin.f32 %v356_v3, 0.0  ;;  %v46_v21 = vunpack.c.3.s8 %v42_v52  ;;  %v151_v25 = vsel %vm147_vm4, 0.75, %v307_v24 }
  0x40   :  { %vm101_vm3 = vcmp.lt.f32.partialorder %v100_v55, 0.0004427343  ;;  %vm149_vm8 = vcmp.eq.f32.partialorder %v49_v16, 2.0  ;;  %v155_v35 = vsel %vm143_vm6, 0.25, %v151_v25  ;;  %vm145_vm9 = vcmp.eq.f32.partialorder %v49_v16, 1.0 }
  0x41   :  { %v99_v62 = vmul.f32 %v214_v27, %v98_v51  ;;  %v152_v27 = vsel %vm148_vm5, 0.75, %v307_v24 }
  0x42   :  { %v156_v39 = vsel %vm144_vm7, 0.25, %v152_v27 }
  0x44   :  { %v216_v37 = vpop.eup %215 }
  0x45   :  { %v218_v41 = vpop.eup %217  ;;  %v69_v42 = vmul.f32 0.6931472, %v216_v37 }
  0x46   :  { %v78_v44 = vmul.f32 0.6931472, %v218_v41  ;;  %v220_v48 = vpop.eup %219  ;;  %v153_v41 = vsel %vm149_vm8, 0.75, %v307_v24 }
  0x47   :  { %v75_v45 = vsel %vm74_vm0, %v72_v34, %v69_v42  ;;  %v87_v54 = vmul.f32 0.6931472, %v220_v48  ;;  %v222_v63 = vpop.eup %221  ;;  %v106_v34 = vmin.f32 %v360_v11, 0.0 }
  0x48   :  { %v119_v49 = vsub.f32 %v115_v33, %v75_v45  ;;  %v84_v50 = vsel %vm83_vm1, %v81_v38, %v78_v44  ;;  %v96_v6 = vmul.f32 0.6931472, %v222_v63  ;;  %v107_v17 = vsub.f32 %v103_v10, %v75_v45 }
  0x49   :  { %v120_v53 = vsub.f32 %v116_v43, %v84_v50  ;;  %v93_v59 = vsel %vm92_vm2, %v90_v46, %v87_v54  ;;  %v108_v20 = vsub.f32 %v104_v14, %v84_v50  ;;  %v50_v33 = vcvt.s32.f32 %v46_v21 }
  0x4a   :  { %v123_v57 = vmul.f32 1.442695, %v119_v49  ;;  %v367_v61 = vsub.f32 %v117_v47, %v93_v59  ;;  %v102_v9 = vsel %vm101_vm3, %v99_v62, %v96_v6  ;;  %v109_v30 = vsub.f32 %v105_v18, %v93_v59 }
  0x4b   :  { %v125_v58 = vmul.f32 1.442695, %v120_v53  ;;  %v371_v13 = vsub.f32 %v118_v4, %v102_v9  ;;  %v110_v47 = vsub.f32 %v106_v34, %v102_v9  ;;  %vm150_vm10 = vcmp.eq.f32.partialorder %v50_v33, 2.0 }
  0x4c   :  { %223 = vpow2.f32 %v123_v57  ;;  %v127_v5 = vmul.f32 1.442695, %v367_v61  ;;  %vm146_vm11 = vcmp.eq.f32.partialorder %v50_v33, 1.0  ;;  %v154_v56 = vsel %vm150_vm10, 0.75, %v307_v24 }
  0x4d   :  { %225 = vpow2.f32 %v125_v58  ;;  %v129_v15 = vmul.f32 1.442695, %v371_v13  ;;  %v158_v62 = vsel %vm146_vm11, 0.25, %v154_v56 }
  0x4e   :  { %227 = vpow2.f32 %v127_v5 }
  0x4f   :  { %229 = vpow2.f32 %v129_v15 }
  0x56   :  { %v224_v19 = vpop.eup %223 }
  0x57   :  { %v226_v22 = vpop.eup %225  ;;  %v131_v23 = vsub.f32 1.0, %v224_v19  ;;  %v135_v0 = vmul.f32 %v224_v19, %v224_v19 }
  0x58   :  { %v132_v26 = vsub.f32 1.0, %v226_v22  ;;  %v136_v1 = vmul.f32 %v226_v22, %v226_v22  ;;  %v228_v31 = vpop.eup %227 }
  0x59   :  { %v139_v28 = vmul.f32 %v131_v23, %v131_v23  ;;  %v159_v29 = vmul.f32 %v135_v0, %v107_v17  ;;  %v133_v37 = vsub.f32 1.0, %v228_v31  ;;  %v137_v38 = vmul.f32 %v228_v31, %v228_v31  ;;  %v230_v11 = vpop.eup %229 }
  0x5a   :  { %v140_v3 = vmul.f32 %v132_v26, %v132_v26  ;;  %v160_v32 = vmul.f32 %v136_v1, %v108_v20  ;;  %v134_v52 = vsub.f32 1.0, %v230_v11 }
  0x5b   :  { %v163_v36 = vmul.f32 %v139_v28, %v119_v49  ;;  %v141_v43 = vmul.f32 %v133_v37, %v133_v37  ;;  %v161_v44 = vmul.f32 %v137_v38, %v109_v30  ;;  %v157_v49 = vsel %vm145_vm9, 0.25, %v153_v41 }
  0x5c   :  { %v164_v40 = vmul.f32 %v140_v3, %v120_v53  ;;  %v138_v53 = vmul.f32 %v230_v11, %v230_v11  ;;  %v142_v58 = vmul.f32 %v134_v52, %v134_v52 }
  0x5d   :  { %v167_v42 = vsel %vm143_vm6, %v159_v29, %v163_v36  ;;  %v165_v50 = vmul.f32 %v141_v43, %v367_v61 }
  0x5e   :  { %v171_v45 = vmul.f32 %v167_v42, %v155_v35  ;;  %v168_v46 = vsel %vm144_vm7, %v160_v32, %v164_v40  ;;  %v162_v59 = vmul.f32 %v138_v53, %v110_v47  ;;  %v166_v63 = vmul.f32 %v142_v58, %v371_v13 }
  0x5f   :  { %v172_v48 = vmul.f32 %v168_v46, %v156_v39  ;;  %v169_v55 = vsel %vm145_vm9, %v161_v44, %v165_v50 }
  0x60   :  { %v175_v51 = vsub.f32 0.0, %v171_v45  ;;  %v173_v57 = vmul.f32 %v169_v55, %v157_v49  ;;  %v170_v2 = vsel %vm146_vm11, %v162_v59, %v166_v63 }
  0x61   :  { %v176_v54 = vsub.f32 0.0, %v172_v48  ;;  %v174_v61 = vmul.f32 %v170_v2, %v158_v62 }
  0x62   :  { %179 = vst [vmem:[#allocation7] sm:$0xff] %v175_v51  ;;  %v177_v60 = vsub.f32 0.0, %v173_v57 }
  0x63   :  { %180 = vst [vmem:[#allocation7 + $0x8] sm:$0xff] %v176_v54  ;;  %v178_v4 = vsub.f32 0.0, %v174_v61 }
  0x64   :  { %181 = vst [vmem:[#allocation7 + $0x10] sm:$0xff] %v177_v60 }
  0x65   :  { %182 = vst [vmem:[#allocation7 + $0x18] sm:$0xff] %v178_v4 }
  0x66   :  { %286 = shalt.err (!%p283_p6)
}
  0x67   :  { %s287_s10 = scalar_lea.hbm %s402_s2, 512 }
  0x68   :  { %p288_p7 = scmp.ne.s32.totalorder %s402_s2, %s287_s10  ;;  %p291_p8 = scmp.lt.u32.totalorder %s287_s10, %s402_s2 }
  0x6a   :  { %p293_p9 = pnand %p291_p8, %p288_p7 }
  0x6c   :  { %296 = shalt.err (!%p293_p9)
}
  0x6d   :  { %194 = dma.vmem_to_hbm [thread:$0]  %s189_s6, 512, %s402_s2, [#allocation4], %s304_s19, %s304_s19, %s305_s20  }
  0x6e   :  { %301 = dma.done.wait [#allocation4], 512  }
  0x6f   :  { %302 = vsyncadd [#allocation4], 4294966784 }
  0x70   :  { %198 = vsyncpa [#allocation3], 1 }
  0x71   :  { %199 = vsyncpa [#allocation6], 1 }
  0x72   :  { %200 = vsyncpa [#allocation4], 1 }

</bundles_post_ra>
